<compile_context>
chip_gen: v7x
topology: tpu7x:2x2x1
jax: 0.10.0
libtpu: 0.0.40
codegen_flags: <defaults>
</compile_context>

<pallas_src>
import functools

import jax
import jax.numpy as jnp
from jax import lax
from jax.experimental import pallas as pl
from jax.experimental.pallas import tpu as pltpu

EPS = 1e-5  # torch.nn.LayerNorm default eps


def _cv_layernorm_kernel(x_ref, params_ref, seg_ref, o_ref, *, inv_feat):
    """x_ref:      (tm, L) f32, columns = interleaved re/im features, `pack` original
                   rows per 128-wide line.
       params_ref: (2, L) f32, row 0 = gamma, row 1 = beta (interleaved + tiled).
       seg_ref:    (L, L) bf16 0/1 block-diagonal matrix; column c selects the lanes
                   in c's (row-within-line, re/im) group, so v @ seg broadcasts every
                   group's sum to all lanes of that group."""
    x = x_ref[...]
    seg = seg_ref[...]

    def group_sum(v):
        # hi/lo bf16 split keeps ~f32 accuracy while using native single-pass bf16
        # MXU matmuls (the MXU is otherwise completely idle in this kernel).
        hi = v.astype(jnp.bfloat16)
        lo = (v - hi.astype(jnp.float32)).astype(jnp.bfloat16)
        return (jnp.dot(hi, seg, preferred_element_type=jnp.float32)
                + jnp.dot(lo, seg, preferred_element_type=jnp.float32))

    mu = group_sum(x) * inv_feat                 # per-group mean, lane-broadcast
    d = x - mu
    var = group_sum(d * d) * inv_feat            # biased variance (torch semantics)

    p = params_ref[...]
    gamma = p[0:1, :]
    beta = p[1:2, :]
    o_ref[...] = d * lax.rsqrt(var + EPS) * gamma + beta


def cv_layernorm_pallas(x, gamma_r, beta_r, gamma_i, beta_i, *, block_rows=2048):
    """CVLayerNorm forward.  x: complex64 (..., F); gamma_*/beta_*: float32 (F,)."""
    orig_shape = x.shape
    f = orig_shape[-1]
    two_f = 2 * f

    # --- interleave real/imag into one f32 stream: (..., F) c64 -> (N, 2F) f32 ---
    # (single fused XLA copy; complex64 cannot be bitcast to f32 at the JAX level)
    xr = jnp.real(x).astype(jnp.float32)
    xi = jnp.imag(x).astype(jnp.float32)
    xf = jnp.stack([xr, xi], axis=-1).reshape(-1, two_f)   # cols: re0,im0,re1,im1,...
    n = xf.shape[0]

    # --- lane packing: `pack` original rows per 128-lane kernel row ---
    if two_f <= 128 and 128 % two_f == 0:
        pack = 128 // two_f
    else:
        pack = 1                      # fallback: (possibly masked) 2F-wide rows
    lanes = pack * two_f

    rem = n % pack
    if rem:                           # at most pack-1 (<=3) rows; usually a no-op
        xf = jnp.pad(xf, ((0, pack - rem), (0, 0)))
    n_rows = xf.shape[0] // pack
    xp = xf.reshape(n_rows, lanes)    # contiguous row-major reshape (free)

    # --- row tile: large, multiple of 8; partial last block handled by Pallas ---
    if n_rows <= 8:
        tm = n_rows                   # full extent (allowed even if not /8)
    else:
        tm = max(8, (min(block_rows, n_rows) // 8) * 8)
    grid = pl.cdiv(n_rows, tm)

    # --- fused affine params: [gamma; beta], interleaved re/im and tiled to L ---
    g = jnp.tile(jnp.stack([gamma_r, gamma_i], axis=-1).reshape(two_f), pack)
    b = jnp.tile(jnp.stack([beta_r, beta_i], axis=-1).reshape(two_f), pack)
    params = jnp.stack([g, b]).astype(jnp.float32)          # (2, lanes)

    # --- 0/1 block-diagonal group-sum matrix (exactly representable in bf16) ---
    lane = jnp.arange(lanes)
    same_line_row = (lane[:, None] // two_f) == (lane[None, :] // two_f)
    same_part = (lane[:, None] % 2) == (lane[None, :] % 2)
    seg = jnp.where(same_line_row & same_part, 1.0, 0.0).astype(jnp.bfloat16)

    row_spec = pl.BlockSpec((tm, lanes), lambda i: (i, 0))
    out = pl.pallas_call(
        functools.partial(_cv_layernorm_kernel, inv_feat=1.0 / f),
        out_shape=jax.ShapeDtypeStruct((n_rows, lanes), jnp.float32),
        grid_spec=pltpu.PrefetchScalarGridSpec(
            num_scalar_prefetch=0,
            grid=(grid,),
            in_specs=[
                row_spec,
                pl.BlockSpec((2, lanes), lambda i: (0, 0)),       # params (fetched once)
                pl.BlockSpec((lanes, lanes), lambda i: (0, 0)),   # seg    (fetched once)
            ],
            out_specs=row_spec,
        ),
        compiler_params=pltpu.CompilerParams(
            # Rows are independent -> shardable across v7x's two TensorCores when grid > 1.
            dimension_semantics=("parallel",),
        ),
    )(xp, params, seg)

    # --- unpack and rebuild complex64 (single fused XLA pass) ---
    out = out.reshape(-1, two_f)[:n].reshape(*orig_shape[:-1], f, 2)
    return lax.complex(out[..., 0], out[..., 1])


# ----------------------- pure-JAX reference (for validation) -----------------------
def cv_layernorm_ref(x, gamma_r, beta_r, gamma_i, beta_i):
    def ln(v, g, b):
        mu = jnp.mean(v, axis=-1, keepdims=True)
        var = jnp.mean((v - mu) ** 2, axis=-1, keepdims=True)
        return (v - mu) / jnp.sqrt(var + EPS) * g + b

    out_r = ln(jnp.real(x).astype(jnp.float32), gamma_r, beta_r)
    out_i = ln(jnp.imag(x).astype(jnp.float32), gamma_i, beta_i)
    return (out_r + 1j * out_i).astype(jnp.complex64)


# ----------------------------------- main -----------------------------------
if __name__ == "__main__":
    B, S, F = 2, 8, 32  # (batch, seq, in_features)
    key = jax.random.PRNGKey(0)
    ks = jax.random.split(key, 6)

    xr = jax.random.normal(ks[0], (B, S, F), jnp.float32)
    xi = jax.random.normal(ks[1], (B, S, F), jnp.float32)
    x = (xr + 1j * xi).astype(jnp.complex64)

    # Non-trivial affine params (torch default is ones/zeros; randomize to exercise it).
    gamma_r = jax.random.uniform(ks[2], (F,), jnp.float32, 0.5, 1.5)
    beta_r = 0.1 * jax.random.normal(ks[3], (F,), jnp.float32)
    gamma_i = jax.random.uniform(ks[4], (F,), jnp.float32, 0.5, 1.5)
    beta_i = 0.1 * jax.random.normal(ks[5], (F,), jnp.float32)

    fn = jax.jit(cv_layernorm_pallas)
    out = fn(x, gamma_r, beta_r, gamma_i, beta_i)
    jax.block_until_ready(out)

    ref = cv_layernorm_ref(x, gamma_r, beta_r, gamma_i, beta_i)
    assert out.shape == x.shape and out.dtype == jnp.complex64
    assert jnp.allclose(jnp.real(out), jnp.real(ref), atol=1e-4, rtol=1e-4), "real mismatch"
    assert jnp.allclose(jnp.imag(out), jnp.imag(ref), atol=1e-4, rtol=1e-4), "imag mismatch"

    print("KERNEL_OK")
</pallas_src>

<mosaic_0001>
module attributes {stable_mosaic.version = 11 : i64} {
  func.func @_cv_layernorm_kernel(%arg0: i32, %arg1: memref<8x128xf32, #tpu.memory_space<vmem>>, %arg2: memref<2x128xf32, #tpu.memory_space<vmem>>, %arg3: memref<128x128xbf16, #tpu.memory_space<vmem>>, %arg4: memref<8x128xf32, #tpu.memory_space<vmem>>) attributes {dimension_semantics = [#tpu.dimension_semantics<parallel>], iteration_bounds = array<i64: 1>, scalar_prefetch = 0 : i64, scratch_operands = 0 : i64, tpu.core_type = #tpu.core_type<tc>, window_params = [{transform_indices = @transform_0, window_bounds = array<i64: 8, 128>}, {pipeline_mode = #tpu.pipeline_mode<synchronous>, transform_indices = @transform_1, window_bounds = array<i64: 2, 128>}, {pipeline_mode = #tpu.pipeline_mode<synchronous>, transform_indices = @transform_2, window_bounds = array<i64: 128, 128>}, {transform_indices = @transform_3, window_bounds = array<i64: 8, 128>}]} {
    %c0 = arith.constant 0 : index
    %c0_0 = arith.constant 0 : index
    %0 = vector.load %arg1[%c0, %c0_0] : memref<8x128xf32, #tpu.memory_space<vmem>>, vector<8x128xf32>
    %c0_1 = arith.constant 0 : index
    %c0_2 = arith.constant 0 : index
    %1 = vector.load %arg3[%c0_1, %c0_2] : memref<128x128xbf16, #tpu.memory_space<vmem>>, vector<128x128xbf16>
    %2 = arith.truncf %0 : vector<8x128xf32> to vector<8x128xbf16>
    %3 = arith.extf %2 : vector<8x128xbf16> to vector<8x128xf32>
    %4 = arith.subf %0, %3 : vector<8x128xf32>
    %5 = arith.truncf %4 : vector<8x128xf32> to vector<8x128xbf16>
    %cst = arith.constant dense<0.000000e+00> : vector<8x128xf32>
    %6 = tpu.matmul %2, %1, %cst {dimension_numbers = #tpu.dot_dimension_numbers<[1], [0], [0], [1], [0, 0, 1, 1], [], []>} : vector<8x128xbf16>, vector<128x128xbf16>, vector<8x128xf32> -> vector<8x128xf32>
    %cst_3 = arith.constant dense<0.000000e+00> : vector<8x128xf32>
    %7 = tpu.matmul %5, %1, %cst_3 {dimension_numbers = #tpu.dot_dimension_numbers<[1], [0], [0], [1], [0, 0, 1, 1], [], []>} : vector<8x128xbf16>, vector<128x128xbf16>, vector<8x128xf32> -> vector<8x128xf32>
    %8 = arith.addf %6, %7 : vector<8x128xf32>
    %cst_4 = arith.constant 3.125000e-02 : f32
    %9 = vector.broadcast %cst_4 : f32 to vector<8x128xf32>
    %10 = arith.mulf %8, %9 : vector<8x128xf32>
    %11 = arith.subf %0, %10 : vector<8x128xf32>
    %12 = arith.mulf %11, %11 : vector<8x128xf32>
    %13 = arith.truncf %12 : vector<8x128xf32> to vector<8x128xbf16>
    %14 = arith.extf %13 : vector<8x128xbf16> to vector<8x128xf32>
    %15 = arith.subf %12, %14 : vector<8x128xf32>
    %16 = arith.truncf %15 : vector<8x128xf32> to vector<8x128xbf16>
    %cst_5 = arith.constant dense<0.000000e+00> : vector<8x128xf32>
    %17 = tpu.matmul %13, %1, %cst_5 {dimension_numbers = #tpu.dot_dimension_numbers<[1], [0], [0], [1], [0, 0, 1, 1], [], []>} : vector<8x128xbf16>, vector<128x128xbf16>, vector<8x128xf32> -> vector<8x128xf32>
    %cst_6 = arith.constant dense<0.000000e+00> : vector<8x128xf32>
    %18 = tpu.matmul %16, %1, %cst_6 {dimension_numbers = #tpu.dot_dimension_numbers<[1], [0], [0], [1], [0, 0, 1, 1], [], []>} : vector<8x128xbf16>, vector<128x128xbf16>, vector<8x128xf32> -> vector<8x128xf32>
    %19 = arith.addf %17, %18 : vector<8x128xf32>
    %cst_7 = arith.constant 3.125000e-02 : f32
    %20 = vector.broadcast %cst_7 : f32 to vector<8x128xf32>
    %21 = arith.mulf %19, %20 : vector<8x128xf32>
    %c0_8 = arith.constant 0 : index
    %c0_9 = arith.constant 0 : index
    %22 = vector.load %arg2[%c0_8, %c0_9] : memref<2x128xf32, #tpu.memory_space<vmem>>, vector<2x128xf32>
    %23 = vector.extract_strided_slice %22 {offsets = [0, 0], sizes = [1, 128], strides = [1, 1]} : vector<2x128xf32> to vector<1x128xf32>
    %24 = vector.extract_strided_slice %22 {offsets = [1, 0], sizes = [1, 128], strides = [1, 1]} : vector<2x128xf32> to vector<1x128xf32>
    %cst_10 = arith.constant 9.99999974E-6 : f32
    %25 = vector.broadcast %cst_10 : f32 to vector<8x128xf32>
    %26 = arith.addf %21, %25 : vector<8x128xf32>
    %27 = math.rsqrt %26 : vector<8x128xf32>
    %28 = arith.mulf %11, %27 : vector<8x128xf32>
    %29 = vector.broadcast %23 : vector<1x128xf32> to vector<8x128xf32>
    %30 = arith.mulf %28, %29 : vector<8x128xf32>
    %31 = vector.broadcast %24 : vector<1x128xf32> to vector<8x128xf32>
    %32 = arith.addf %30, %31 : vector<8x128xf32>
    %c0_11 = arith.constant 0 : index
    %c0_12 = arith.constant 0 : index
    %33 = vector.load %arg4[%c0_11, %c0_12] : memref<8x128xf32, #tpu.memory_space<vmem>>, vector<8x128xf32>
    tpu.vector_store %arg4[%c0_11, %c0_12], %32 {strides = array<i32>} : memref<8x128xf32, #tpu.memory_space<vmem>>, vector<8x128xf32>,
    return
  }
  func.func @transform_0(%arg0: i32) -> (i32, i32) {
    %c0_i32 = arith.constant 0 : i32
    %c0_i32_0 = arith.constant 0 : i32
    return %arg0, %c0_i32 : i32, i32
  }
  func.func @transform_1(%arg0: i32) -> (i32, i32) {
    %c0_i32 = arith.constant 0 : i32
    %c0_i32_0 = arith.constant 0 : i32
    %c0_i32_1 = arith.constant 0 : i32
    return %c0_i32, %c0_i32_0 : i32, i32
  }
  func.func @transform_2(%arg0: i32) -> (i32, i32) {
    %c0_i32 = arith.constant 0 : i32
    %c0_i32_0 = arith.constant 0 : i32
    %c0_i32_1 = arith.constant 0 : i32
    return %c0_i32, %c0_i32_0 : i32, i32
  }
  func.func @transform_3(%arg0: i32) -> (i32, i32) {
    %c0_i32 = arith.constant 0 : i32
    %c0_i32_0 = arith.constant 0 : i32
    return %arg0, %c0_i32 : i32, i32
  }
}

</mosaic_0001>

<bundles_post_ra>
// kernel: custom-call.1
= control target key start
LH: loop header
LB: loop body
LE: loop exit
PB: predicated region body
PF: predicated region fallthrough
CT: control target
= control target key end

     0   :  { %s59_s0 = inlined_call_operand.hbm [shape: c64[2,8,32], index: 0, kind: input, shape index: {}]   ;;  %s60_s1 = inlined_call_operand.vmem [shape: f32[2,8,32], index: 1, kind: output, shape index: {}]  }
   0x1   :  { %s2_s8 = scalar_lea.hbm %s59_s0, 256 }
   0x2   :  { %3 = vsyncpa [#allocation0], 0  ;;  %s4_s11 = sshll.u32 %s60_s1, 4  ;;  %s34_s14 = scalar_lea.hbm %s59_s0, 512  ;;  %s5_s11 = int_to_ptr.vmem [resolvable:$true] %s4_s11 }
   0x3   :  { %p11_p0 = scmp.ne.s32.totalorder %s2_s8, %s34_s14  ;;  %p13_p1 = scmp.lt.u32.totalorder %s2_s8, %s59_s0 }
   0x4   :  { %p14_p2 = scmp.lt.u32.totalorder %s34_s14, %s34_s14  ;;  %p16_p4 = scmp.lt.u32.totalorder %s34_s14, %s2_s8 }
   0x6   :  { %p15_p3 = por %p14_p2, %p13_p1 }
   0x8   :  { %p17_p5 = por %p16_p4, %p15_p3 }
   0xa   :  { %p18_p6 = pnand %p17_p5, %p11_p0 }
   0xc   :  { %21 = shalt.err (!%p18_p6)  }
   0xd   :  { %s22_s17 = scalar_lea.vmem %s5_s11, 256  ;;  %p27_p8 = scmp.lt.s32.totalorder %s5_s11, %s5_s11 }
   0xe   :  { %p23_p7 = scmp.ne.s32.totalorder %s5_s11, %s22_s17  ;;  %p28_p9 = scmp.lt.s32.totalorder %s22_s17, %s22_s17 }
  0x10   :  { %p29_p10 = por %p28_p9, %p27_p8 }
  0x12   :  { %p30_p11 = pnand %p29_p10, %p23_p7 }
  0x14   :  { %33 = shalt.err (!%p30_p11)  }
  0x15   :  { %7 = dma.hbm_to_vmem [thread:$0]  %s2_s8, 256, %s5_s11, [#allocation0] }
  0x16   :  { %35 = dma.done.wait [#allocation0], 256  }
  0x17   :  { %36 = vsyncadd [#allocation0], 4294967040 }
  0x18   :  { %9 = vsyncpa [#allocation0], 1 }

// kernel: custom-call
= control target key start
LH: loop header
LB: loop body
LE: loop exit
PB: predicated region body
PF: predicated region fallthrough
CT: control target
= control target key end

     0   :  { %2 = vsyncpa [#allocation0], 0  ;;  %s61_s0 = inlined_call_operand.hbm [shape: c64[2,8,32], index: 0, kind: input, shape index: {}]   ;;  %s62_s1 = inlined_call_operand.vmem [shape: f32[2,8,32], index: 1, kind: output, shape index: {}]  }
   0x1   :  { %s3_s8 = sshll.u32 %s62_s1, 4  ;;  %s9_s11 = scalar_lea.hbm %s61_s0, 256  ;;  %s4_s8 = int_to_ptr.vmem [resolvable:$true] %s3_s8 }
   0x2   :  { %p10_p0 = scmp.ne.s32.totalorder %s61_s0, %s9_s11  ;;  %s11_s16 = scalar_lea.hbm %s61_s0, 512 }
   0x3   :  { %p12_p1 = scmp.lt.u32.totalorder %s11_s16, %s9_s11  ;;  %p13_p2 = scmp.lt.u32.totalorder %s9_s11, %s61_s0 }
   0x5   :  { %p14_p3 = por %p13_p2, %p12_p1 }
   0x7   :  { %p15_p4 = pnand %p14_p3, %p10_p0 }
   0x9   :  { %18 = shalt.err (!%p15_p4)  }
   0xa   :  { %s19_s1 = scalar_lea.vmem %s4_s8, 256  ;;  %p24_p6 = scmp.lt.s32.totalorder %s4_s8, %s4_s8 }
   0xb   :  { %p20_p5 = scmp.ne.s32.totalorder %s4_s8, %s19_s1  ;;  %p25_p7 = scmp.lt.s32.totalorder %s19_s1, %s19_s1 }
   0xd   :  { %p26_p8 = por %p25_p7, %p24_p6 }
   0xf   :  { %p27_p9 = pnand %p26_p8, %p20_p5 }
  0x11   :  { %30 = shalt.err (!%p27_p9)  }
  0x12   :  { %6 = dma.hbm_to_vmem [thread:$0]  %s61_s0, 256, %s4_s8, [#allocation0] }
  0x13   :  { %31 = dma.done.wait [#allocation0], 256  }
  0x14   :  { %32 = vsyncadd [#allocation0], 4294967040 }
  0x15   :  { %8 = vsyncpa [#allocation0], 1 }

// kernel: tile.13
= control target key start
LH: loop header
LB: loop body
LE: loop exit
PB: predicated region body
PF: predicated region fallthrough
CT: control target
= control target key end

     0   :  { %s22_s0 = inlined_call_operand.vmem [shape: f32[64], index: 0, kind: input, shape index: {}]   ;;  %s23_s1 = inlined_call_operand.vmem [shape: f32[2,64], index: 1, kind: output, shape index: {}]  }
   0x1   :  { %v4_v0 = vld [vmem:[%s22_s0] ss:$0 sm:$0xff] }
   0x2   :  { %5 = vst [vmem:[%s23_s1] sm:$0x3] %v4_v0 }

// kernel: tile.12
= control target key start
LH: loop header
LB: loop body
LE: loop exit
PB: predicated region body
PF: predicated region fallthrough
CT: control target
= control target key end

     0   :  { %s259_s10 = smov 62   ;;  %s260_s11 = smov 58   ;;  %vm3_vm0 = vcmask 15360   ;;  %vm9_vm1 = vcmask 523760   ;;  %vm15_vm2 = vcmask 507360   ;;  %vm21_vm3 = vcmask 490960   ;;  %s399_s0 = inlined_call_operand.vmem [shape: f32[32,2], index: 0, kind: input, shape index: {}]   ;;  %s400_s1 = inlined_call_operand.vmem [shape: f32[64], index: 1, kind: output, shape index: {}]  }
   0x1   :  { %v197_v0 = vld [vmem:[%s399_s0 + $0x1f] sm:$0x1]   ;;  %v199_v1 = vld [vmem:[%s399_s0 + $0x1d] sm:$0x1]   ;;  %v198_v2 = vld [vmem:[%s399_s0 + $0x1e] sm:$0x1]  }
   0x2   :  { %7 = vrot.lane.b32.xlu0 %v197_v0, %s259_s10  ;;  %19 = vrot.lane.b32.xlu1 %v199_v1, %s260_s11  ;;  %v200_v3 = vld [vmem:[%s399_s0 + $0x1c] sm:$0x1]   ;;  %s261_s16 = smov 60   ;;  %s262_s17 = smov 56   ;;  %v201_v4 = vld [vmem:[%s399_s0 + $0x1b] sm:$0x1]  }
   0x3   :  { %v202_v5 = vld [vmem:[%s399_s0 + $0x1a] sm:$0x1]   ;;  %s263_s22 = smov 54   ;;  %s264_s23 = smov 52   ;;  %v203_v6 = vld [vmem:[%s399_s0 + $0x19] sm:$0x1]  }
   0x4   :  { %v204_v7 = vld [vmem:[%s399_s0 + $0x18] sm:$0x1]   ;;  %s265_s28 = smov 50   ;;  %s266_s29 = smov 48   ;;  %v205_v8 = vld [vmem:[%s399_s0 + $0x17] sm:$0x1]  }
   0x5   :  { %v206_v9 = vld [vmem:[%s399_s0 + $0x16] sm:$0x1]   ;;  %v2_v10 = vld [vmem:[%s399_s0] sm:$0x1]   ;;  %s267_s7 = smov 46   ;;  %s268_s8 = smov 44  }
   0x6   :  { %13 = vrot.lane.b32.xlu0 %v198_v2, %s261_s16  ;;  %25 = vrot.lane.b32.xlu1 %v200_v3, %s262_s17  ;;  %4 = vst.msk [vmem:[#allocation0] sm:$0x1] %vm3_vm0, %v2_v10   ;;  %v207_v11 = vld [vmem:[%s399_s0 + $0x15] sm:$0x1]   ;;  %v208_v12 = vld [vmem:[%s399_s0 + $0x14] sm:$0x1]  }
   0x7   :  { %s269_s13 = smov 42   ;;  %s270_s14 = smov 40   ;;  %v209_v13 = vld [vmem:[%s399_s0 + $0x13] sm:$0x1]   ;;  %v210_v14 = vld [vmem:[%s399_s0 + $0x12] sm:$0x1]  }
   0x8   :  { %s271_s19 = smov 38   ;;  %s272_s20 = smov 36   ;;  %v211_v15 = vld [vmem:[%s399_s0 + $0x11] sm:$0x1]   ;;  %v212_v16 = vld [vmem:[%s399_s0 + $0x10] sm:$0x1]  }
   0x9   :  { %s273_s25 = smov 34   ;;  %s274_s26 = smov 32   ;;  %v213_v17 = vld [vmem:[%s399_s0 + $0xf] sm:$0x1]   ;;  %v214_v18 = vld [vmem:[%s399_s0 + $0xe] sm:$0x1]  }
   0xa   :  { %31 = vrot.lane.b32.xlu0 %v201_v4, %s263_s22  ;;  %37 = vrot.lane.b32.xlu1 %v202_v5, %s264_s23  ;;  %s275_s2 = smov 30   ;;  %s276_s3 = smov 28   ;;  %v215_v19 = vld [vmem:[%s399_s0 + $0xd] sm:$0x1]   ;;  %v216_v20 = vld [vmem:[%s399_s0 + $0xc] sm:$0x1]  }
   0xb   :  { %s278_s9 = smov 24   ;;  %v217_v21 = vld [vmem:[%s399_s0 + $0xb] sm:$0x1]   ;;  %v218_v22 = vld [vmem:[%s399_s0 + $0xa] sm:$0x1]   ;;  %s280_s15 = smov 20  }
   0xc   :  { %v219_v23 = vld [vmem:[%s399_s0 + $0x9] sm:$0x1]   ;;  %v220_v24 = vld [vmem:[%s399_s0 + $0x8] sm:$0x1]   ;;  %s282_s21 = smov 16   ;;  %s284_s27 = smov 12  }
   0xd   :  { %v221_v25 = vld [vmem:[%s399_s0 + $0x7] sm:$0x1]   ;;  %v222_v26 = vld [vmem:[%s399_s0 + $0x6] sm:$0x1]   ;;  %v223_v27 = vld [vmem:[%s399_s0 + $0x5] sm:$0x1]  }
   0xe   :  { %43 = vrot.lane.b32.xlu0 %v203_v6, %s265_s28  ;;  %49 = vrot.lane.b32.xlu1 %v204_v7, %s266_s29  ;;  %v224_v28 = vld [vmem:[%s399_s0 + $0x4] sm:$0x1]   ;;  %s286_s4 = smov 8   ;;  %v225_v29 = vld [vmem:[%s399_s0 + $0x3] sm:$0x1]   ;;  %s288_s10 = smov 4  }
   0xf   :  { %v226_v30 = vld [vmem:[%s399_s0 + $0x2] sm:$0x1]   ;;  %v227_v31 = vld [vmem:[%s399_s0 + $0x1] sm:$0x1]   ;;  %s289_s0 = smov 2   ;;  %vm27_vm4 = vcmask 474560  }
  0x10   :  { %vm33_vm5 = vcmask 458160   ;;  %vm39_vm6 = vcmask 441760   ;;  %vm45_vm7 = vcmask 425360   ;;  %vm51_vm8 = vcmask 408960  }
  0x11   :  { %vm57_vm9 = vcmask 392560   ;;  %vm63_vm10 = vcmask 376160   ;;  %vm69_vm11 = vcmask 359760   ;;  %vm75_vm12 = vcmask 343360  }
  0x12   :  { %55 = vrot.lane.b32.xlu0 %v205_v8, %s267_s7  ;;  %61 = vrot.lane.b32.xlu1 %v206_v9, %s268_s8  ;;  %s277_s8 = smov 26   ;;  %vm81_vm13 = vcmask 326960   ;;  %vm87_vm14 = vcmask 310560   ;;  %vm93_vm15 = vcmask 294160   ;;  %vm99_vm0 = vcmask 277760  }
  0x16   :  { %67 = vrot.lane.b32.xlu0 %v207_v11, %s269_s13  ;;  %73 = vrot.lane.b32.xlu1 %v208_v12, %s270_s14  ;;  %s279_s14 = smov 22  }
  0x1a   :  { %79 = vrot.lane.b32.xlu0 %v209_v13, %s271_s19  ;;  %85 = vrot.lane.b32.xlu1 %v210_v14, %s272_s20  ;;  %s281_s20 = smov 18  }
  0x1e   :  { %91 = vrot.lane.b32.xlu0 %v211_v15, %s273_s25  ;;  %97 = vrot.lane.b32.xlu1 %v212_v16, %s274_s26  ;;  %s283_s26 = smov 14  }
  0x22   :  { %103 = vrot.lane.b32.xlu0 %v213_v17, %s275_s2  ;;  %109 = vrot.lane.b32.xlu1 %v214_v18, %s276_s3  ;;  %s285_s3 = smov 10  }
  0x26   :  { %115 = vrot.lane.b32.xlu0 %v215_v19, %s277_s8  ;;  %121 = vrot.lane.b32.xlu1 %v216_v20, %s278_s9  ;;  %s287_s9 = smov 6  }
  0x2a   :  { %127 = vrot.lane.b32.xlu0 %v217_v21, %s279_s14  ;;  %133 = vrot.lane.b32.xlu1 %v218_v22, %s280_s15 }
  0x2e   :  { %139 = vrot.lane.b32.xlu0 %v219_v23, %s281_s20  ;;  %145 = vrot.lane.b32.xlu1 %v220_v24, %s282_s21 }
  0x32   :  { %151 = vrot.lane.b32.xlu0 %v221_v25, %s283_s26  ;;  %157 = vrot.lane.b32.xlu1 %v222_v26, %s284_s27 }
  0x36   :  { %163 = vrot.lane.b32.xlu0 %v223_v27, %s285_s3  ;;  %169 = vrot.lane.b32.xlu1 %v224_v28, %s286_s4 }
  0x3a   :  { %175 = vrot.lane.b32.xlu0 %v225_v29, %s287_s9  ;;  %181 = vrot.lane.b32.xlu1 %v226_v30, %s288_s10 }
  0x3e   :  { %187 = vrot.lane.b32.xlu0 %v227_v31, %s289_s0 }
  0x74   :  { %v8_v32 = vpop.permute.xlu0 %7   ;;  %v20_v33 = vpop.permute.xlu1 %19  }
  0x75   :  { %10 = vst.msk [vmem:[#allocation0] sm:$0x1] %vm9_vm1, %v8_v32   ;;  %vm105_vm1 = vcmask 261360  }
  0x78   :  { %v14_v34 = vpop.permute.xlu0 %13   ;;  %v26_v35 = vpop.permute.xlu1 %25  }
  0x79   :  { %16 = vst.msk [vmem:[#allocation0] sm:$0x1] %vm15_vm2, %v14_v34   ;;  %vm111_vm2 = vcmask 244960  }
  0x7a   :  { %22 = vst.msk [vmem:[#allocation0] sm:$0x1] %vm21_vm3, %v20_v33   ;;  %vm117_vm3 = vcmask 228560  }
  0x7b   :  { %28 = vst.msk [vmem:[#allocation0] sm:$0x1] %vm27_vm4, %v26_v35   ;;  %vm123_vm4 = vcmask 212160  }
  0x7c   :  { %v32_v36 = vpop.permute.xlu0 %31   ;;  %v38_v37 = vpop.permute.xlu1 %37  }
  0x7d   :  { %34 = vst.msk [vmem:[#allocation0] sm:$0x1] %vm33_vm5, %v32_v36   ;;  %vm129_vm5 = vcmask 195760  }
  0x7e   :  { %40 = vst.msk [vmem:[#allocation0] sm:$0x1] %vm39_vm6, %v38_v37   ;;  %vm135_vm6 = vcmask 179360  }
  0x80   :  { %v44_v38 = vpop.permute.xlu0 %43   ;;  %v50_v39 = vpop.permute.xlu1 %49  }
  0x81   :  { %46 = vst.msk [vmem:[#allocation0] sm:$0x1] %vm45_vm7, %v44_v38   ;;  %vm141_vm7 = vcmask 162960  }
  0x82   :  { %52 = vst.msk [vmem:[#allocation0] sm:$0x1] %vm51_vm8, %v50_v39   ;;  %vm147_vm8 = vcmask 146560  }
  0x84   :  { %v56_v40 = vpop.permute.xlu0 %55   ;;  %v62_v41 = vpop.permute.xlu1 %61  }
  0x85   :  { %58 = vst.msk [vmem:[#allocation0] sm:$0x1] %vm57_vm9, %v56_v40   ;;  %vm153_vm9 = vcmask 130160  }
  0x86   :  { %64 = vst.msk [vmem:[#allocation0] sm:$0x1] %vm63_vm10, %v62_v41   ;;  %vm159_vm10 = vcmask 113760  }
  0x88   :  { %v68_v42 = vpop.permute.xlu0 %67   ;;  %v74_v43 = vpop.permute.xlu1 %73  }
  0x89   :  { %70 = vst.msk [vmem:[#allocation0] sm:$0x1] %vm69_vm11, %v68_v42   ;;  %vm165_vm11 = vcmask 97360  }
  0x8a   :  { %76 = vst.msk [vmem:[#allocation0] sm:$0x1] %vm75_vm12, %v74_v43   ;;  %vm171_vm12 = vcmask 80960  }
  0x8c   :  { %v80_v44 = vpop.permute.xlu0 %79   ;;  %v86_v45 = vpop.permute.xlu1 %85  }
  0x8d   :  { %82 = vst.msk [vmem:[#allocation0] sm:$0x1] %vm81_vm13, %v80_v44   ;;  %vm177_vm13 = vcmask 64560  }
  0x8e   :  { %88 = vst.msk [vmem:[#allocation0] sm:$0x1] %vm87_vm14, %v86_v45   ;;  %vm183_vm14 = vcmask 48160  }
  0x90   :  { %v92_v46 = vpop.permute.xlu0 %91   ;;  %v98_v47 = vpop.permute.xlu1 %97  }
  0x91   :  { %94 = vst.msk [vmem:[#allocation0] sm:$0x1] %vm93_vm15, %v92_v46   ;;  %vm189_vm15 = vcmask 31760  }
  0x92   :  { %100 = vst.msk [vmem:[#allocation0] sm:$0x1] %vm99_vm0, %v98_v47  }
  0x94   :  { %v104_v48 = vpop.permute.xlu0 %103   ;;  %v110_v49 = vpop.permute.xlu1 %109  }
  0x95   :  { %106 = vst.msk [vmem:[#allocation0] sm:$0x1] %vm105_vm1, %v104_v48  }
  0x96   :  { %112 = vst.msk [vmem:[#allocation0] sm:$0x1] %vm111_vm2, %v110_v49  }
  0x98   :  { %v116_v50 = vpop.permute.xlu0 %115   ;;  %v122_v51 = vpop.permute.xlu1 %121  }
  0x99   :  { %118 = vst.msk [vmem:[#allocation0] sm:$0x1] %vm117_vm3, %v116_v50  }
  0x9a   :  { %124 = vst.msk [vmem:[#allocation0] sm:$0x1] %vm123_vm4, %v122_v51  }
  0x9c   :  { %v128_v52 = vpop.permute.xlu0 %127   ;;  %v134_v53 = vpop.permute.xlu1 %133  }
  0x9d   :  { %130 = vst.msk [vmem:[#allocation0] sm:$0x1] %vm129_vm5, %v128_v52  }
  0x9e   :  { %136 = vst.msk [vmem:[#allocation0] sm:$0x1] %vm135_vm6, %v134_v53  }
  0xa0   :  { %v140_v54 = vpop.permute.xlu0 %139   ;;  %v146_v55 = vpop.permute.xlu1 %145  }
  0xa1   :  { %142 = vst.msk [vmem:[#allocation0] sm:$0x1] %vm141_vm7, %v140_v54  }
  0xa2   :  { %148 = vst.msk [vmem:[#allocation0] sm:$0x1] %vm147_vm8, %v146_v55  }
  0xa4   :  { %v152_v56 = vpop.permute.xlu0 %151   ;;  %v158_v57 = vpop.permute.xlu1 %157  }
  0xa5   :  { %154 = vst.msk [vmem:[#allocation0] sm:$0x1] %vm153_vm9, %v152_v56  }
  0xa6   :  { %160 = vst.msk [vmem:[#allocation0] sm:$0x1] %vm159_vm10, %v158_v57  }
  0xa8   :  { %v164_v58 = vpop.permute.xlu0 %163   ;;  %v170_v59 = vpop.permute.xlu1 %169  }
  0xa9   :  { %166 = vst.msk [vmem:[#allocation0] sm:$0x1] %vm165_vm11, %v164_v58  }
  0xaa   :  { %172 = vst.msk [vmem:[#allocation0] sm:$0x1] %vm171_vm12, %v170_v59  }
  0xac   :  { %v176_v60 = vpop.permute.xlu0 %175   ;;  %v182_v61 = vpop.permute.xlu1 %181  }
  0xad   :  { %178 = vst.msk [vmem:[#allocation0] sm:$0x1] %vm177_vm13, %v176_v60  }
  0xae   :  { %184 = vst.msk [vmem:[#allocation0] sm:$0x1] %vm183_vm14, %v182_v61  }
  0xb0   :  { %v188_v62 = vpop.permute.xlu0 %187  }
  0xb1   :  { %190 = vst.msk [vmem:[#allocation0] sm:$0x1] %vm189_vm15, %v188_v62  }
  0xb8   :  { %v194_v63 = vld [vmem:[#allocation0] sm:$0x1] }
  0xb9   :  { %196 = vst [vmem:[%s400_s1] sm:$0x1] %v194_v63 }

// kernel: tile.15
= control target key start
LH: loop header
LB: loop body
LE: loop exit
PB: predicated region body
PF: predicated region fallthrough
CT: control target
= control target key end

     0   :  { %vm7_vm0 = vcmask 523264   ;;  %vm13_vm1 = vcmask 1048064   ;;  %s39_s0 = inlined_call_operand.vmem [shape: f32[2,64], index: 0, kind: input, shape index: {}]   ;;  %s40_s1 = inlined_call_operand.vmem [shape: f32[1,128], index: 1, kind: output, shape index: {}]  }
   0x1   :  { %v4_v0 = vld [vmem:[%s39_s0] sm:$0x3]  ;;  %s22_s0 = smov 64  }
   0x2   :  { %5 = vst [vmem:[#allocation1] sm:$0x3] %v4_v0 }
   0x9   :  { %v10_v1 = vld [vmem:[#allocation1 + $0x1] sm:$0x1]   ;;  %v6_v2 = vld [vmem:[#allocation1] sm:$0x1]  }
   0xa   :  { %11 = vrot.lane.b32.xlu0 %v10_v1, %s22_s0  ;;  %8 = vst.msk [vmem:[#allocation0] sm:$0x1] %vm7_vm0, %v6_v2  }
  0x7c   :  { %v12_v3 = vpop.permute.xlu0 %11  }
  0x7d   :  { %14 = vst.msk [vmem:[#allocation0] sm:$0x1] %vm13_vm1, %v12_v3  }
  0x84   :  { %v18_v4 = vld [vmem:[#allocation0] sm:$0x1] }
  0x85   :  { %20 = vst [vmem:[%s40_s1] sm:$0x1] %v18_v4 }

// kernel: custom-call.2
= control target key start
LH: loop header
LB: loop body
LE: loop exit
PB: predicated region body
PF: predicated region fallthrough
CT: control target
= control target key end

     0   :  { %s126_s0 = inlined_call_operand.vmem [shape: f32[2,8,32], index: 0, kind: input, shape index: {}]   ;;  %s127_s1 = inlined_call_operand.vmem [shape: f32[2,8,32], index: 1, kind: input, shape index: {}]   ;;  %s128_s2 = inlined_call_operand.hbm [shape: c64[2,8,32], index: 2, kind: output, shape index: {}]  }
   0x1   :  { %s87_s11 = scalar_lea.hbm %s128_s2, 256 }
   0x2   :  { %4 = vsyncpa [#allocation0], 0  ;;  %s5_s14 = sshll.u32 %s126_s0, 4  ;;  %s6_s14 = int_to_ptr.vmem [resolvable:$true] %s5_s14 }
   0x3   :  { %s18_s15 = scalar_lea.vmem %s6_s14, 256  ;;  %p23_p1 = scmp.lt.s32.totalorder %s6_s14, %s6_s14 }
   0x4   :  { %p19_p0 = scmp.ne.s32.totalorder %s6_s14, %s18_s15  ;;  %p24_p2 = scmp.lt.s32.totalorder %s18_s15, %s18_s15 }
   0x6   :  { %p25_p3 = por %p24_p2, %p23_p1 }
   0x8   :  { %p26_p4 = pnand %p25_p3, %p19_p0 }
   0xa   :  { %29 = shalt.err (!%p26_p4)  }
   0xb   :  { %p31_p5 = scmp.ne.s32.totalorder %s128_s2, %s87_s11  ;;  %s32_s0 = scalar_lea.hbm %s128_s2, 512 }
   0xc   :  { %p33_p6 = scmp.lt.u32.totalorder %s32_s0, %s87_s11  ;;  %p34_p7 = scmp.lt.u32.totalorder %s87_s11, %s128_s2 }
   0xe   :  { %p35_p8 = por %p34_p7, %p33_p6 }
  0x10   :  { %p36_p9 = pnand %p35_p8, %p31_p5 }
  0x12   :  { %39 = shalt.err (!%p36_p9)  }
  0x13   :  { %8 = dma.vmem_to_hbm [thread:$0]  %s6_s14, 256, %s128_s2, [#allocation0] }
  0x14   :  { %65 = dma.done.wait [#allocation0], 256  }
  0x15   :  { %66 = vsyncadd [#allocation0], 4294967040 }
  0x16   :  { %10 = vsyncpa [#allocation0], 1 }
  0x17   :  { %11 = vsyncpa [#allocation1], 0  ;;  %s12_s28 = sshll.u32 %s127_s1, 4  ;;  %s13_s28 = int_to_ptr.vmem [resolvable:$true] %s12_s28 }
  0x18   :  { %s40_s29 = scalar_lea.vmem %s13_s28, 256  ;;  %p45_p11 = scmp.lt.s32.totalorder %s13_s28, %s13_s28 }
  0x19   :  { %p41_p10 = scmp.ne.s32.totalorder %s13_s28, %s40_s29  ;;  %p46_p12 = scmp.lt.s32.totalorder %s40_s29, %s40_s29 }
  0x1b   :  { %p47_p13 = por %p46_p12, %p45_p11 }
  0x1d   :  { %p48_p0 = pnand %p47_p13, %p41_p10 }
  0x1f   :  { %51 = shalt.err (!%p48_p0)  }
  0x20   :  { %p53_p1 = scmp.ne.s32.totalorder %s87_s11, %s32_s0  ;;  %p56_p2 = scmp.lt.u32.totalorder %s32_s0, %s32_s0 }
  0x22   :  { %p57_p3 = por %p56_p2, %p34_p7 }
  0x24   :  { %p59_p4 = por %p57_p3, %p33_p6 }
  0x26   :  { %p60_p5 = pnand %p59_p4, %p53_p1 }
  0x28   :  { %63 = shalt.err (!%p60_p5)  }
  0x29   :  { %15 = dma.vmem_to_hbm [thread:$0]  %s13_s28, 256, %s87_s11, [#allocation1] }
  0x2a   :  { %67 = dma.done.wait [#allocation1], 256  }
  0x2b   :  { %68 = vsyncadd [#allocation1], 4294967040 }
  0x2c   :  { %17 = vsyncpa [#allocation1], 1 }

// kernel: cv_layernorm_pallas.1
= control target key start
LH: loop header
LB: loop body
LE: loop exit
PB: predicated region body
PF: predicated region fallthrough
CT: control target
= control target key end

     0   :  { %v415_v0 = vmov 0.0   ;;  %vm416_vm0 = vmmov 0   ;;  %v256_v28 = vlaneseq  ;;  %s540_s2 = inlined_call_operand.vmem [shape: bf16[128,128], index: 2, kind: input, shape index: {}]   ;;  %s541_s0 = inlined_call_operand.vmem [shape: f32[8,128], index: 0, kind: input, shape index: {}]   ;;  %s542_s1 = inlined_call_operand.vmem [shape: f32[2,128], index: 1, kind: input, shape index: {}]   ;;  %s543_s3 = inlined_call_operand.vmem [shape: f32[8,128], index: 3, kind: output, shape index: {}]  }
   0x1   :  { %315 = vmatprep.subr.bf16.mxu0 %v415_v0  ;;  %v441_v1 = vld [vmem:[%s540_s2] sm:$0xff]   ;;  %331 = vmatprep.mubr.msk.bf16.mxu0 %vm416_vm0, %v415_v0  ;;  %v452_v2 = vld [vmem:[%s540_s2 + $0x8] sm:$0xff]   ;;  %v461_v3 = vld [vmem:[%s540_s2 + $0x10] sm:$0xff]  }
   0x2   :  { %355 = vmatprep.subr.bf16.mxu1 %v415_v0  ;;  %371 = vmatprep.mubr.msk.bf16.mxu1 %vm416_vm0, %v415_v0  ;;  %v470_v4 = vld [vmem:[%s540_s2 + $0x18] sm:$0xff]   ;;  %v479_v5 = vld [vmem:[%s540_s2 + $0x20] sm:$0xff]   ;;  %v410_v8 = vld [vmem:[%s540_s2 + $0x28] sm:$0xff]   ;;  %v257_v32 = vshrl.u32 %v256_v28, 7 }
   0x3   :  { %316 = vmatpush3.bf16.msra.mxu0 %v441_v1  ;;  %356 = vmatpush3.bf16.msra.mxu1 %v441_v1  ;;  %v15_v6 = vld [vmem:[%s541_s0] sm:$0xff]  ;;  %v411_v10 = vld [vmem:[%s540_s2 + $0x30] sm:$0xff]   ;;  %v412_v12 = vld [vmem:[%s540_s2 + $0x38] sm:$0xff]  }
   0x4   :  { %317 = vmatprep.subr.bf16.mxu0 %v415_v0  ;;  %357 = vmatprep.subr.bf16.mxu1 %v415_v0  ;;  %v32_v7 = vpack.c.bf16 %v15_v6, %v15_v6  ;;  %v258_v33 = vsub.s32 0, %v257_v32  ;;  %v252_v34 = vld [vmem:[%s542_s1] sm:$0x3]  ;;  %v263_v35 = vsub.s32 1, %v257_v32 }
   0x6   :  { %v33_v9 = vunpack.c.l.bf16 %v32_v7  ;;  %v259_v36 = vrot.slane %v252_v34, %v258_v33  ;;  %v264_v39 = vrot.slane %v252_v34, %v263_v35 }
   0x7   :  { %318 = vmatpush3.bf16.msra.mxu0 %v452_v2  ;;  %358 = vmatpush3.bf16.msra.mxu1 %v452_v2 }
   0x8   :  { %319 = vmatprep.subr.bf16.mxu0 %v415_v0  ;;  %359 = vmatprep.subr.bf16.mxu1 %v415_v0  ;;  %v34_v11 = vsub.f32 %v15_v6, %v33_v9 }
   0xa   :  { %v35_v13 = vpack.c.bf16 %v34_v11, %v34_v11 }
   0xb   :  { %320 = vmatpush3.bf16.msra.mxu0 %v461_v3  ;;  %360 = vmatpush3.bf16.msra.mxu1 %v461_v3 }
   0xc   :  { %321 = vmatprep.subr.bf16.mxu0 %v415_v0  ;;  %361 = vmatprep.subr.bf16.mxu1 %v415_v0 }
   0xf   :  { %322 = vmatpush3.bf16.msra.mxu0 %v470_v4  ;;  %362 = vmatpush3.bf16.msra.mxu1 %v470_v4 }
  0x10   :  { %323 = vmatprep.subr.bf16.mxu0 %v415_v0  ;;  %363 = vmatprep.subr.bf16.mxu1 %v415_v0 }
  0x13   :  { %324 = vmatpush3.bf16.msra.mxu0 %v479_v5  ;;  %364 = vmatpush3.bf16.msra.mxu1 %v479_v5 }
  0x14   :  { %325 = vmatprep.subr.bf16.mxu0 %v415_v0  ;;  %365 = vmatprep.subr.bf16.mxu1 %v415_v0 }
  0x17   :  { %326 = vmatpush3.bf16.msra.mxu0 %v410_v8  ;;  %366 = vmatpush3.bf16.msra.mxu1 %v410_v8 }
  0x18   :  { %327 = vmatprep.subr.bf16.mxu0 %v415_v0  ;;  %367 = vmatprep.subr.bf16.mxu1 %v415_v0 }
  0x1b   :  { %328 = vmatpush3.bf16.msra.mxu0 %v411_v10  ;;  %368 = vmatpush3.bf16.msra.mxu1 %v411_v10 }
  0x1c   :  { %329 = vmatprep.subr.bf16.mxu0 %v415_v0  ;;  %369 = vmatprep.subr.bf16.mxu1 %v415_v0 }
  0x1f   :  { %330 = vmatpush3.bf16.msra.mxu0 %v412_v12  ;;  %370 = vmatpush3.bf16.msra.mxu1 %v412_v12 }
  0x20   :  { %335 = vmatprep.subr.bf16.mxu0 %v415_v0  ;;  %375 = vmatprep.subr.bf16.mxu1 %v415_v0 }
  0x22   :  { %332 = vmatmul.mubr.bf16.vlgmr.msra.gmra.mrb[0].mxu0 %v35_v13 }
  0x23   :  { %336 = vmatpush3.bf16.msra.mxu0 %v441_v1  ;;  %351 = vmatprep.mubr.msk.bf16.mxu0 %vm416_vm0, %v415_v0 }
  0x24   :  { %337 = vmatprep.subr.bf16.mxu0 %v415_v0 }
  0x27   :  { %338 = vmatpush3.bf16.msra.mxu0 %v452_v2 }
  0x28   :  { %339 = vmatprep.subr.bf16.mxu0 %v415_v0 }
  0x2b   :  { %340 = vmatpush3.bf16.msra.mxu0 %v461_v3 }
  0x2c   :  { %341 = vmatprep.subr.bf16.mxu0 %v415_v0 }
  0x2f   :  { %342 = vmatpush3.bf16.msra.mxu0 %v470_v4 }
  0x30   :  { %343 = vmatprep.subr.bf16.mxu0 %v415_v0 }
  0x33   :  { %344 = vmatpush3.bf16.msra.mxu0 %v479_v5 }
  0x34   :  { %345 = vmatprep.subr.bf16.mxu0 %v415_v0 }
  0x37   :  { %346 = vmatpush3.bf16.msra.mxu0 %v410_v8 }
  0x38   :  { %347 = vmatprep.subr.bf16.mxu0 %v415_v0 }
  0x3b   :  { %348 = vmatpush3.bf16.msra.mxu0 %v411_v10 }
  0x3c   :  { %349 = vmatprep.subr.bf16.mxu0 %v415_v0 }
  0x3f   :  { %350 = vmatpush3.bf16.msra.mxu0 %v412_v12 }
  0x42   :  { %352 = vmatmul.mubr.bf16.vlgmr.msra.gmra.mrb[0].mxu0 %v32_v7 }
 0x115   :  { %v158_v14 = vpop.f32.mrb[0].mxu0 }
 0x116   :  { %v164_v15 = vmul.f32 0.03125, %v158_v14  ;;  %v353_v16 = vpop.f32.mrb[1].mxu0 }
 0x117   :  { %v161_v17 = vpop.f32.mrb[2].mxu0 }
 0x118   :  { %v165_v18 = vsub.f32 %v15_v6, %v164_v15  ;;  %v354_v19 = vpop.f32.mrb[3].mxu0 }
 0x11a   :  { %v166_v20 = vmul.f32 %v165_v18, %v165_v18 }
 0x11c   :  { %v167_v21 = vpack.c.bf16 %v166_v20, %v166_v20 }
 0x11e   :  { %v168_v22 = vunpack.c.l.bf16 %v167_v21 }
 0x120   :  { %v169_v23 = vsub.f32 %v166_v20, %v168_v22 }
 0x122   :  { %v170_v24 = vpack.c.bf16 %v169_v23, %v169_v23 }
 0x124   :  { %372 = vmatmul.mubr.bf16.vlgmr.msra.gmra.mrb[0].mxu1 %v170_v24 }
 0x125   :  { %376 = vmatpush3.bf16.msra.mxu1 %v441_v1  ;;  %391 = vmatprep.mubr.msk.bf16.mxu1 %vm416_vm0, %v415_v0 }
 0x126   :  { %377 = vmatprep.subr.bf16.mxu1 %v415_v0 }
 0x129   :  { %378 = vmatpush3.bf16.msra.mxu1 %v452_v2 }
 0x12a   :  { %379 = vmatprep.subr.bf16.mxu1 %v415_v0 }
 0x12d   :  { %380 = vmatpush3.bf16.msra.mxu1 %v461_v3 }
 0x12e   :  { %381 = vmatprep.subr.bf16.mxu1 %v415_v0 }
 0x131   :  { %382 = vmatpush3.bf16.msra.mxu1 %v470_v4 }
 0x132   :  { %383 = vmatprep.subr.bf16.mxu1 %v415_v0 }
 0x135   :  { %384 = vmatpush3.bf16.msra.mxu1 %v479_v5 }
 0x136   :  { %385 = vmatprep.subr.bf16.mxu1 %v415_v0 }
 0x139   :  { %386 = vmatpush3.bf16.msra.mxu1 %v410_v8 }
 0x13a   :  { %387 = vmatprep.subr.bf16.mxu1 %v415_v0 }
 0x13d   :  { %388 = vmatpush3.bf16.msra.mxu1 %v411_v10 }
 0x13e   :  { %389 = vmatprep.subr.bf16.mxu1 %v415_v0 }
 0x141   :  { %390 = vmatpush3.bf16.msra.mxu1 %v412_v12 }
 0x144   :  { %392 = vmatmul.mubr.bf16.vlgmr.msra.gmra.mrb[0].mxu1 %v167_v21 }
 0x217   :  { %v245_v25 = vpop.f32.mrb[0].mxu1 }
 0x218   :  { %v251_v26 = vmul.f32 0.03125, %v245_v25  ;;  %v393_v27 = vpop.f32.mrb[1].mxu1 }
 0x219   :  { %v248_v29 = vpop.f32.mrb[2].mxu1 }
 0x21a   :  { %v253_v30 = vadd.f32 1e-05, %v251_v26  ;;  %v394_v31 = vpop.f32.mrb[3].mxu1 }
 0x21c   :  { %413 = vrsqrt.f32 %v253_v30 }
 0x226   :  { %v414_v37 = vpop.eup %413 }
 0x227   :  { %v255_v38 = vmul.f32 %v414_v37, %v165_v18 }
 0x229   :  { %v260_v40 = vmul.f32 %v259_v36, %v255_v38 }
 0x22b   :  { %v265_v41 = vadd.f32 %v264_v39, %v260_v40 }
 0x22d   :  { %266 = vst [vmem:[%s543_s3] sm:$0xff] %v265_v41 }

</bundles_post_ra>
